<compile_context>
chip_gen: v5e
topology: v5e:2x2
jax: 0.10.0
libtpu: 0.0.40
codegen_flags: <defaults>
</compile_context>

<pallas_src>
import jax
import jax.numpy as jnp
from jax.experimental import pallas as pl
from jax.experimental.pallas import tpu as pltpu


# ---------------------------------------------------------------------------
# Kernel: one row-block of  ELU(x @ W + b)
# ---------------------------------------------------------------------------
def _enc_out_kernel(x_ref, w_ref, b_ref, o_ref):
    x = x_ref[...]                                                   # (bm, K) f32
    z = jnp.dot(x, w_ref[...], preferred_element_type=jnp.float32)  # MXU matmul
    z = z + b_ref[...]                                               # bias broadcast
    # ELU (alpha = 1.0): z if z > 0 else exp(z) - 1.  exp() runs on the EUP
    # slot, off the VALU critical path.
    # TODO(synk): switch the negative branch to expm1 once Mosaic exposes a
    # lowering; exp(z)-1 stays well inside the 1e-4 tolerance at these scales.
    neg = jnp.exp(jnp.minimum(z, 0.0)) - 1.0
    o_ref[...] = jnp.where(z > 0.0, z, neg)


# ---------------------------------------------------------------------------
# One-time parameter prep (hoisted out of the per-call path).
# ---------------------------------------------------------------------------
def prepare_enc_out_params(w, b):
    """Pad the output-feature dim to a multiple of 128 (lane-dense stores) and
    cast to f32.  Call once at init; reuse the returned tensors every forward.

    w: (K, N)  -- stored transposed vs nn.Linear, so the kernel computes x @ w
    b: (N,)
    returns (w_padded (K, n_pad), b_padded (1, n_pad), n)
    """
    k, n = w.shape
    n_pad = ((n + 127) // 128) * 128
    w_p = jnp.asarray(w, jnp.float32)
    b_p = jnp.asarray(b, jnp.float32)
    if n_pad != n:
        w_p = jnp.pad(w_p, ((0, 0), (0, n_pad - n)))
        b_p = jnp.pad(b_p, (0, n_pad - n))
    return w_p, b_p.reshape(1, n_pad), n


# ---------------------------------------------------------------------------
# Row-tile selection with a VMEM-footprint guard (v5e 16 MiB scoped default is
# the tightest budget; also keeps headroom on v7x's 64 MiB physical VMEM).
# ---------------------------------------------------------------------------
_VMEM_BUDGET_BYTES = 12 * 1024 * 1024


def _pick_block_rows(batch, k, n_pad, block_rows):
    bm = batch if batch <= block_rows else block_rows

    def footprint(m):
        # 2x-buffered x block + (up to) 2x weight + 2x out block + bias, f32.
        return 4 * (2 * m * k + 2 * k * n_pad + 2 * m * n_pad + n_pad)

    # Halve the row tile (kept a multiple of 8, as required for partial blocks)
    # until it fits the budget.
    # TODO(synk): for very large prod(input_shape) (K ~ 64K+) add a K grid axis
    # marked "arbitrary" with a VMEM f32 accumulator instead of shrinking bm.
    while bm > 8 and footprint(bm) > _VMEM_BUDGET_BYTES:
        bm = max(8, ((bm // 2) + 7) // 8 * 8)
    return bm


# ---------------------------------------------------------------------------
# pallas_call builder + forward wrapper
# ---------------------------------------------------------------------------
def _make_enc_out_call(batch, bm, k, n_pad, *, single_buffer_params):
    # Weight / bias use a constant index map (resident across grid steps);
    # Buffered(1) drops their pointless second VMEM buffer.
    wb_kwargs = (
        dict(pipeline_mode=pl.Buffered(1)) if single_buffer_params else {}
    )
    return pl.pallas_call(
        _enc_out_kernel,
        out_shape=jax.ShapeDtypeStruct((batch, n_pad), jnp.float32),
        grid_spec=pltpu.PrefetchScalarGridSpec(
            num_scalar_prefetch=0,
            grid=(pl.cdiv(batch, bm),),
            in_specs=[
                pl.BlockSpec((bm, k), lambda i: (i, 0)),              # activations
                pl.BlockSpec((k, n_pad), lambda i: (0, 0), **wb_kwargs),  # weight
                pl.BlockSpec((1, n_pad), lambda i: (0, 0), **wb_kwargs),  # bias
            ],
            out_specs=pl.BlockSpec((bm, n_pad), lambda i: (i, 0)),
        ),
        compiler_params=pltpu.CompilerParams(
            dimension_semantics=("parallel",)),
    )


def enc_out(x, w_padded, b_padded, n_out, *, block_rows=1024):
    """EncOut forward: flatten -> x @ W + b -> ELU.

    x        : (batch, *input_shape)
    w_padded : (K, n_pad)  from prepare_enc_out_params
    b_padded : (1, n_pad)  from prepare_enc_out_params
    n_out    : true output features (48)
    returns  : (batch, n_out) f32
    """
    batch = x.shape[0]
    x2 = x.reshape(batch, -1)              # flatten is a free metadata reshape
    if x2.dtype != jnp.float32:
        x2 = x2.astype(jnp.float32)
    k = x2.shape[1]
    n_pad = w_padded.shape[1]

    bm = _pick_block_rows(batch, k, n_pad, block_rows)

    try:
        out = _make_enc_out_call(
            batch, bm, k, n_pad, single_buffer_params=True
        )(x2, w_padded, b_padded)
    except Exception:
        # pl.Buffered(1) not accepted on this build: fall back to the default
        # double-buffering (weight/bias are still resident via constant maps).
        out = _make_enc_out_call(
            batch, bm, k, n_pad, single_buffer_params=False
        )(x2, w_padded, b_padded)

    return out[:, :n_out]


def enc_out_ref(x, w, b):
    """Pure-JAX reference mirroring the PyTorch forward (flatten -> Linear -> ELU)."""
    batch = x.shape[0]
    z = x.reshape(batch, -1) @ w + b
    return jax.nn.elu(z)


if __name__ == "__main__":
    # Shapes implied by the module: input_shape = (4, 16, 16) -> K = 1024, N = 48
    B = 2
    INPUT_SHAPE = (4, 16, 16)
    K = INPUT_SHAPE[0] * INPUT_SHAPE[1] * INPUT_SHAPE[2]
    N = 48

    key = jax.random.PRNGKey(0)
    kx, kw, kb = jax.random.split(key, 3)

    x = jax.random.normal(kx, (B,) + INPUT_SHAPE, dtype=jnp.float32)
    # Stored as (in_features, out_features), i.e. transposed vs nn.Linear.
    w = jax.random.normal(kw, (K, N), dtype=jnp.float32) * 0.05
    b = jax.random.normal(kb, (N,), dtype=jnp.float32) * 0.05

    # One-time init work (padding / casts hoisted out of the forward path).
    w_p, b_p, n_out = prepare_enc_out_params(w, b)

    out = enc_out(x, w_p, b_p, n_out)
    out = jax.block_until_ready(out)

    ref = enc_out_ref(x, w, b)
    assert out.shape == (B, N)
    assert jnp.allclose(out, ref, atol=1e-4, rtol=1e-4), "mismatch vs JAX reference"

    print("KERNEL_OK")
</pallas_src>

<mosaic_0001>
module attributes {stable_mosaic.version = 11 : i64} {
  func.func @_enc_out_kernel(%arg0: i32, %arg1: memref<2x1024xf32, #tpu.memory_space<vmem>>, %arg2: memref<1024x128xf32, #tpu.memory_space<vmem>>, %arg3: memref<1x128xf32, #tpu.memory_space<vmem>>, %arg4: memref<2x128xf32, #tpu.memory_space<vmem>>) attributes {dimension_semantics = [#tpu.dimension_semantics<parallel>], iteration_bounds = array<i64: 1>, scalar_prefetch = 0 : i64, scratch_operands = 0 : i64, tpu.core_type = #tpu.core_type<tc>, window_params = [{transform_indices = @transform_0, window_bounds = array<i64: 2, 1024>}, {pipeline_mode = #tpu.pipeline_mode<synchronous>, transform_indices = @transform_1, window_bounds = array<i64: 1024, 128>}, {pipeline_mode = #tpu.pipeline_mode<synchronous>, transform_indices = @transform_2, window_bounds = array<i64: 1, 128>}, {transform_indices = @transform_3, window_bounds = array<i64: 2, 128>}]} {
    %c0 = arith.constant 0 : index
    %c0_0 = arith.constant 0 : index
    %0 = vector.load %arg1[%c0, %c0_0] : memref<2x1024xf32, #tpu.memory_space<vmem>>, vector<2x1024xf32>
    %c0_1 = arith.constant 0 : index
    %c0_2 = arith.constant 0 : index
    %1 = vector.load %arg2[%c0_1, %c0_2] : memref<1024x128xf32, #tpu.memory_space<vmem>>, vector<1024x128xf32>
    %cst = arith.constant dense<0.000000e+00> : vector<2x128xf32>
    %2 = tpu.matmul %0, %1, %cst {dimension_numbers = #tpu.dot_dimension_numbers<[1], [0], [0], [1], [0, 0, 1, 1], [], []>} : vector<2x1024xf32>, vector<1024x128xf32>, vector<2x128xf32> -> vector<2x128xf32>
    %c0_3 = arith.constant 0 : index
    %c0_4 = arith.constant 0 : index
    %3 = vector.load %arg3[%c0_3, %c0_4] : memref<1x128xf32, #tpu.memory_space<vmem>>, vector<1x128xf32>
    %4 = vector.broadcast %3 : vector<1x128xf32> to vector<2x128xf32>
    %5 = arith.addf %2, %4 : vector<2x128xf32>
    %cst_5 = arith.constant 0.000000e+00 : f32
    %6 = vector.broadcast %cst_5 : f32 to vector<2x128xf32>
    %7 = arith.minimumf %5, %6 : vector<2x128xf32>
    %8 = math.exp %7 : vector<2x128xf32>
    %cst_6 = arith.constant 1.000000e+00 : f32
    %9 = vector.broadcast %cst_6 : f32 to vector<2x128xf32>
    %10 = arith.subf %8, %9 : vector<2x128xf32>
    %cst_7 = arith.constant 0.000000e+00 : f32
    %11 = vector.broadcast %cst_7 : f32 to vector<2x128xf32>
    %12 = arith.cmpf ogt, %5, %11 : vector<2x128xf32>
    %13 = arith.select %12, %5, %10 : vector<2x128xi1>, vector<2x128xf32>
    %c0_8 = arith.constant 0 : index
    %c0_9 = arith.constant 0 : index
    %14 = vector.load %arg4[%c0_8, %c0_9] : memref<2x128xf32, #tpu.memory_space<vmem>>, vector<2x128xf32>
    tpu.vector_store %arg4[%c0_8, %c0_9], %13 {strides = array<i32>} : memref<2x128xf32, #tpu.memory_space<vmem>>, vector<2x128xf32>,
    return
  }
  func.func @transform_0(%arg0: i32) -> (i32, i32) {
    %c0_i32 = arith.constant 0 : i32
    %c0_i32_0 = arith.constant 0 : i32
    return %arg0, %c0_i32 : i32, i32
  }
  func.func @transform_1(%arg0: i32) -> (i32, i32) {
    %c0_i32 = arith.constant 0 : i32
    %c0_i32_0 = arith.constant 0 : i32
    %c0_i32_1 = arith.constant 0 : i32
    return %c0_i32, %c0_i32_0 : i32, i32
  }
  func.func @transform_2(%arg0: i32) -> (i32, i32) {
    %c0_i32 = arith.constant 0 : i32
    %c0_i32_0 = arith.constant 0 : i32
    %c0_i32_1 = arith.constant 0 : i32
    return %c0_i32, %c0_i32_0 : i32, i32
  }
  func.func @transform_3(%arg0: i32) -> (i32, i32) {
    %c0_i32 = arith.constant 0 : i32
    %c0_i32_0 = arith.constant 0 : i32
    return %arg0, %c0_i32 : i32, i32
  }
}

module attributes {stable_mosaic.version = 11 : i64} {
  func.func @_enc_out_kernel(%arg0: i32, %arg1: memref<2x1024xf32, #tpu.memory_space<vmem>>, %arg2: memref<1024x128xf32, #tpu.memory_space<vmem>>, %arg3: memref<1x128xf32, #tpu.memory_space<vmem>>, %arg4: memref<2x128xf32, #tpu.memory_space<vmem>>) attributes {dimension_semantics = [#tpu.dimension_semantics<parallel>], iteration_bounds = array<i64: 1>, scalar_prefetch = 0 : i64, scratch_operands = 0 : i64, tpu.core_type = #tpu.core_type<tc>, window_params = [{transform_indices = @transform_0, window_bounds = array<i64: 2, 1024>}, {pipeline_mode = #tpu.pipeline_mode<synchronous>, transform_indices = @transform_1, window_bounds = array<i64: 1024, 128>}, {pipeline_mode = #tpu.pipeline_mode<synchronous>, transform_indices = @transform_2, window_bounds = array<i64: 1, 128>}, {transform_indices = @transform_3, window_bounds = array<i64: 2, 128>}]} {
    %c0 = arith.constant 0 : index
    %c0_0 = arith.constant 0 : index
    %0 = vector.load %arg1[%c0, %c0_0] : memref<2x1024xf32, #tpu.memory_space<vmem>>, vector<2x1024xf32>
    %c0_1 = arith.constant 0 : index
    %c0_2 = arith.constant 0 : index
    %1 = vector.load %arg2[%c0_1, %c0_2] : memref<1024x128xf32, #tpu.memory_space<vmem>>, vector<1024x128xf32>
    %cst = arith.constant dense<0.000000e+00> : vector<2x128xf32>
    %2 = tpu.matmul %0, %1, %cst {dimension_numbers = #tpu.dot_dimension_numbers<[1], [0], [0], [1], [0, 0, 1, 1], [], []>} : vector<2x1024xf32>, vector<1024x128xf32>, vector<2x128xf32> -> vector<2x128xf32>
    %c0_3 = arith.constant 0 : index
    %c0_4 = arith.constant 0 : index
    %3 = vector.load %arg3[%c0_3, %c0_4] : memref<1x128xf32, #tpu.memory_space<vmem>>, vector<1x128xf32>
    %4 = vector.broadcast %3 : vector<1x128xf32> to vector<2x128xf32>
    %5 = arith.addf %2, %4 : vector<2x128xf32>
    %cst_5 = arith.constant 0.000000e+00 : f32
    %6 = vector.broadcast %cst_5 : f32 to vector<2x128xf32>
    %7 = arith.minimumf %5, %6 : vector<2x128xf32>
    %8 = math.exp %7 : vector<2x128xf32>
    %cst_6 = arith.constant 1.000000e+00 : f32
    %9 = vector.broadcast %cst_6 : f32 to vector<2x128xf32>
    %10 = arith.subf %8, %9 : vector<2x128xf32>
    %cst_7 = arith.constant 0.000000e+00 : f32
    %11 = vector.broadcast %cst_7 : f32 to vector<2x128xf32>
    %12 = arith.cmpf ogt, %5, %11 : vector<2x128xf32>
    %13 = arith.select %12, %5, %10 : vector<2x128xi1>, vector<2x128xf32>
    %c0_8 = arith.constant 0 : index
    %c0_9 = arith.constant 0 : index
    %14 = vector.load %arg4[%c0_8, %c0_9] : memref<2x128xf32, #tpu.memory_space<vmem>>, vector<2x128xf32>
    tpu.vector_store %arg4[%c0_8, %c0_9], %13 {strides = array<i32>} : memref<2x128xf32, #tpu.memory_space<vmem>>, vector<2x128xf32>,
    return
  }
  func.func @transform_0(%arg0: i32) -> (i32, i32) {
    %c0_i32 = arith.constant 0 : i32
    %c0_i32_0 = arith.constant 0 : i32
    return %arg0, %c0_i32 : i32, i32
  }
  func.func @transform_1(%arg0: i32) -> (i32, i32) {
    %c0_i32 = arith.constant 0 : i32
    %c0_i32_0 = arith.constant 0 : i32
    %c0_i32_1 = arith.constant 0 : i32
    return %c0_i32, %c0_i32_0 : i32, i32
  }
  func.func @transform_2(%arg0: i32) -> (i32, i32) {
    %c0_i32 = arith.constant 0 : i32
    %c0_i32_0 = arith.constant 0 : i32
    %c0_i32_1 = arith.constant 0 : i32
    return %c0_i32, %c0_i32_0 : i32, i32
  }
  func.func @transform_3(%arg0: i32) -> (i32, i32) {
    %c0_i32 = arith.constant 0 : i32
    %c0_i32_0 = arith.constant 0 : i32
    return %arg0, %c0_i32 : i32, i32
  }
}

</mosaic_0001>

<bundles_post_ra>
// kernel: tpu_custom_call.1
= control target key start
LH: loop header
LB: loop body
LE: loop exit
PB: predicated region body
PF: predicated region fallthrough
CT: control target
= control target key end

     0   :  { %8 = vsyncpa [#allocation3], 0  ;;  %s509_s0 = inlined_call_operand.hbm [shape: f32[2,1024], index: 0, kind: input, shape index: {}]   ;;  %s510_s1 = inlined_call_operand.hbm [shape: f32[1024,128], index: 1, kind: input, shape index: {}]   ;;  %s511_s2 = inlined_call_operand.vmem [shape: f32[1,128], index: 2, kind: input, shape index: {}]   ;;  %s512_s3 = inlined_call_operand.hbm [shape: f32[2,128], index: 3, kind: output, shape index: {}]  }
   0x1   :  { %9 = vsyncpa [#allocation6], 0 }
   0x2   :  { %10 = vsyncpa [#allocation4], 0  ;;  %s16_s14 = sshll.u32 %s509_s0, 4  ;;  %s472_s15 = smov [#allocation2]   ;;  %s17_s14 = int_to_ptr.hbm [resolvable:$true] %s16_s14 }
   0x3   :  { %s18_s16 = sshll.u32 %s472_s15, 4  ;;  %s26_s19 = sshll.u32 %s510_s1, 4  ;;  %s19_s16 = int_to_ptr.vmem [resolvable:$true] %s18_s16  ;;  %s27_s19 = int_to_ptr.hbm [resolvable:$true] %s26_s19 }
   0x4   :  { %21 = dma.hbm_to_vmem [thread:$0]  %s17_s14, 256, %s19_s16, [#allocation3]  }
   0x5   :  { %s473_s20 = smov [#allocation5]   ;;  %s474_s22 = smov 128  }
   0x6   :  { %s28_s21 = sshll.u32 %s473_s20, 4  ;;  %s475_s23 = smov 8   ;;  %s29_s21 = int_to_ptr.vmem [resolvable:$true] %s28_s21 }
   0x7   :  { %34 = dma.hbm_to_vmem [thread:$0]  %s27_s19, 16384, %s29_s21, [#allocation6], %s474_s22, %s474_s22, %s475_s23  }
   0x8   :  { %466 = dma.done.wait [#allocation3], 256  }
   0x9   :  { %467 = vsyncadd [#allocation3], 4294967040 }
   0xa   :  { %468 = dma.done.wait [#allocation6], 16384  }
   0xb   :  { %469 = vsyncadd [#allocation6], 4294950912  ;;  %v94_v0 = vld [vmem:[#allocation5 + $0x178] sm:$0xff]  ;;  %v93_v2 = vld [vmem:[#allocation5 + $0x170] sm:$0xff]  ;;  %s374_s27 = sshll.u32 %s512_s3, 4  ;;  %s375_s27 = int_to_ptr.hbm [resolvable:$true] %s374_s27 }
   0xc   :  { %v62_v1 = vld [vmem:[#allocation5 + $0x78] sm:$0xff]  ;;  %240 = vmatpush.msra.mxu2 %v94_v0  ;;  %v61_v4 = vld [vmem:[#allocation5 + $0x70] sm:$0xff]  ;;  %v92_v6 = vld [vmem:[#allocation5 + $0x168] sm:$0xff] }
   0xd   :  { %200 = vmatpush.msra.mxu0 %v62_v1  ;;  %v110_v3 = vld [vmem:[#allocation5 + $0x1f8] sm:$0xff]  ;;  %v109_v7 = vld [vmem:[#allocation5 + $0x1f0] sm:$0xff]  ;;  %v60_v8 = vld [vmem:[#allocation5 + $0x68] sm:$0xff] }
   0xe   :  { %v78_v5 = vld [vmem:[#allocation5 + $0xf8] sm:$0xff]  ;;  %260 = vmatpush.msra.mxu3 %v110_v3  ;;  %241 = vmatpush.msra.mxu2 %v93_v2  ;;  %v77_v9 = vld [vmem:[#allocation5 + $0xf0] sm:$0xff]  ;;  %v108_v10 = vld [vmem:[#allocation5 + $0x1e8] sm:$0xff] }
   0xf   :  { %220 = vmatpush.msra.mxu1 %v78_v5  ;;  %201 = vmatpush.msra.mxu0 %v61_v4  ;;  %v91_v11 = vld [vmem:[#allocation5 + $0x160] sm:$0xff]  ;;  %v76_v13 = vld [vmem:[#allocation5 + $0xe8] sm:$0xff]  ;;  %v90_v16 = vld [vmem:[#allocation5 + $0x158] sm:$0xff] }
  0x10   :  { %261 = vmatpush.msra.mxu3 %v109_v7  ;;  %v59_v12 = vld [vmem:[#allocation5 + $0x60] sm:$0xff]  ;;  %242 = vmatpush.msra.mxu2 %v92_v6  ;;  %v58_v17 = vld [vmem:[#allocation5 + $0x58] sm:$0xff]  ;;  %v89_v20 = vld [vmem:[#allocation5 + $0x150] sm:$0xff] }
  0x11   :  { %221 = vmatpush.msra.mxu1 %v77_v9  ;;  %202 = vmatpush.msra.mxu0 %v60_v8  ;;  %v107_v14 = vld [vmem:[#allocation5 + $0x1e0] sm:$0xff]  ;;  %v106_v18 = vld [vmem:[#allocation5 + $0x1d8] sm:$0xff]  ;;  %v57_v21 = vld [vmem:[#allocation5 + $0x50] sm:$0xff] }
  0x12   :  { %v75_v15 = vld [vmem:[#allocation5 + $0xe0] sm:$0xff]  ;;  %262 = vmatpush.msra.mxu3 %v108_v10  ;;  %243 = vmatpush.msra.mxu2 %v91_v11  ;;  %v74_v19 = vld [vmem:[#allocation5 + $0xd8] sm:$0xff]  ;;  %v105_v22 = vld [vmem:[#allocation5 + $0x1d0] sm:$0xff] }
  0x13   :  { %222 = vmatpush.msra.mxu1 %v76_v13  ;;  %203 = vmatpush.msra.mxu0 %v59_v12  ;;  %v73_v23 = vld [vmem:[#allocation5 + $0xd0] sm:$0xff]  ;;  %v88_v24 = vld [vmem:[#allocation5 + $0x148] sm:$0xff]  ;;  %v87_v28 = vld [vmem:[#allocation5 + $0x140] sm:$0xff] }
  0x14   :  { %263 = vmatpush.msra.mxu3 %v107_v14  ;;  %244 = vmatpush.msra.mxu2 %v90_v16  ;;  %v56_v25 = vld [vmem:[#allocation5 + $0x48] sm:$0xff]  ;;  %v55_v29 = vld [vmem:[#allocation5 + $0x40] sm:$0xff]  ;;  %v86_v32 = vld [vmem:[#allocation5 + $0x138] sm:$0xff] }
  0x15   :  { %223 = vmatpush.msra.mxu1 %v75_v15  ;;  %204 = vmatpush.msra.mxu0 %v58_v17  ;;  %v104_v26 = vld [vmem:[#allocation5 + $0x1c8] sm:$0xff]  ;;  %v103_v30 = vld [vmem:[#allocation5 + $0x1c0] sm:$0xff]  ;;  %v54_v33 = vld [vmem:[#allocation5 + $0x38] sm:$0xff] }
  0x16   :  { %264 = vmatpush.msra.mxu3 %v106_v18  ;;  %245 = vmatpush.msra.mxu2 %v89_v20  ;;  %v72_v27 = vld [vmem:[#allocation5 + $0xc8] sm:$0xff]  ;;  %v71_v31 = vld [vmem:[#allocation5 + $0xc0] sm:$0xff]  ;;  %v102_v34 = vld [vmem:[#allocation5 + $0x1b8] sm:$0xff] }
  0x17   :  { %224 = vmatpush.msra.mxu1 %v74_v19  ;;  %205 = vmatpush.msra.mxu0 %v57_v21  ;;  %v70_v35 = vld [vmem:[#allocation5 + $0xb8] sm:$0xff]  ;;  %v85_v36 = vld [vmem:[#allocation5 + $0x130] sm:$0xff]  ;;  %v84_v40 = vld [vmem:[#allocation5 + $0x128] sm:$0xff] }
  0x18   :  { %265 = vmatpush.msra.mxu3 %v105_v22  ;;  %246 = vmatpush.msra.mxu2 %v88_v24  ;;  %v53_v37 = vld [vmem:[#allocation5 + $0x30] sm:$0xff]  ;;  %v52_v41 = vld [vmem:[#allocation5 + $0x28] sm:$0xff]  ;;  %v83_v44 = vld [vmem:[#allocation5 + $0x120] sm:$0xff] }
  0x19   :  { %225 = vmatpush.msra.mxu1 %v73_v23  ;;  %206 = vmatpush.msra.mxu0 %v56_v25  ;;  %v101_v38 = vld [vmem:[#allocation5 + $0x1b0] sm:$0xff]  ;;  %v100_v42 = vld [vmem:[#allocation5 + $0x1a8] sm:$0xff]  ;;  %v51_v45 = vld [vmem:[#allocation5 + $0x20] sm:$0xff] }
  0x1a   :  { %266 = vmatpush.msra.mxu3 %v104_v26  ;;  %247 = vmatpush.msra.mxu2 %v87_v28  ;;  %v69_v39 = vld [vmem:[#allocation5 + $0xb0] sm:$0xff]  ;;  %v68_v43 = vld [vmem:[#allocation5 + $0xa8] sm:$0xff]  ;;  %v99_v46 = vld [vmem:[#allocation5 + $0x1a0] sm:$0xff] }
  0x1b   :  { %226 = vmatpush.msra.mxu1 %v72_v27  ;;  %207 = vmatpush.msra.mxu0 %v55_v29  ;;  %v67_v47 = vld [vmem:[#allocation5 + $0xa0] sm:$0xff]  ;;  %v82_v48 = vld [vmem:[#allocation5 + $0x118] sm:$0xff]  ;;  %v81_v52 = vld [vmem:[#allocation5 + $0x110] sm:$0xff] }
  0x1c   :  { %267 = vmatpush.msra.mxu3 %v103_v30  ;;  %248 = vmatpush.msra.mxu2 %v86_v32  ;;  %v50_v49 = vld [vmem:[#allocation5 + $0x18] sm:$0xff]  ;;  %v49_v53 = vld [vmem:[#allocation5 + $0x10] sm:$0xff]  ;;  %v80_v56 = vld [vmem:[#allocation5 + $0x108] sm:$0xff] }
  0x1d   :  { %227 = vmatpush.msra.mxu1 %v71_v31  ;;  %208 = vmatpush.msra.mxu0 %v54_v33  ;;  %v98_v50 = vld [vmem:[#allocation5 + $0x198] sm:$0xff]  ;;  %v97_v54 = vld [vmem:[#allocation5 + $0x190] sm:$0xff]  ;;  %v48_v57 = vld [vmem:[#allocation5 + $0x8] sm:$0xff] }
  0x1e   :  { %268 = vmatpush.msra.mxu3 %v102_v34  ;;  %249 = vmatpush.msra.mxu2 %v85_v36  ;;  %v66_v51 = vld [vmem:[#allocation5 + $0x98] sm:$0xff]  ;;  %v65_v55 = vld [vmem:[#allocation5 + $0x90] sm:$0xff]  ;;  %v96_v58 = vld [vmem:[#allocation5 + $0x188] sm:$0xff] }
  0x1f   :  { %228 = vmatpush.msra.mxu1 %v70_v35  ;;  %209 = vmatpush.msra.mxu0 %v53_v37  ;;  %v64_v59 = vld [vmem:[#allocation5 + $0x88] sm:$0xff]  ;;  %v79_v60 = vld [vmem:[#allocation5 + $0x100] sm:$0xff]  ;;  %v158_v62 = vld [vmem:[#allocation5 + $0x378] sm:$0xff] }
  0x20   :  { %269 = vmatpush.msra.mxu3 %v101_v38  ;;  %250 = vmatpush.msra.mxu2 %v84_v40  ;;  %v47_v61 = vld [vmem:[#allocation5] sm:$0xff]  ;;  %v126_v0 = vld [vmem:[#allocation5 + $0x278] sm:$0xff]  ;;  %v157_v2 = vld [vmem:[#allocation5 + $0x370] sm:$0xff] }
  0x21   :  { %229 = vmatpush.msra.mxu1 %v69_v39  ;;  %210 = vmatpush.msra.mxu0 %v52_v41  ;;  %v95_v63 = vld [vmem:[#allocation5 + $0x180] sm:$0xff]  ;;  %v174_v1 = vld [vmem:[#allocation5 + $0x3f8] sm:$0xff]  ;;  %v125_v4 = vld [vmem:[#allocation5 + $0x270] sm:$0xff] }
  0x22   :  { %270 = vmatpush.msra.mxu3 %v100_v42  ;;  %251 = vmatpush.msra.mxu2 %v83_v44  ;;  %v63_v3 = vld [vmem:[#allocation5 + $0x80] sm:$0xff]  ;;  %v142_v5 = vld [vmem:[#allocation5 + $0x2f8] sm:$0xff]  ;;  %v156_v6 = vld [vmem:[#allocation5 + $0x368] sm:$0xff] }
  0x23   :  { %230 = vmatpush.msra.mxu1 %v68_v43  ;;  %211 = vmatpush.msra.mxu0 %v51_v45  ;;  %v173_v7 = vld [vmem:[#allocation5 + $0x3f0] sm:$0xff]  ;;  %v124_v8 = vld [vmem:[#allocation5 + $0x268] sm:$0xff]  ;;  %v155_v10 = vld [vmem:[#allocation5 + $0x360] sm:$0xff] }
  0x24   :  { %271 = vmatpush.msra.mxu3 %v99_v46  ;;  %252 = vmatpush.msra.mxu2 %v82_v48  ;;  %v141_v9 = vld [vmem:[#allocation5 + $0x2f0] sm:$0xff]  ;;  %v172_v11 = vld [vmem:[#allocation5 + $0x3e8] sm:$0xff]  ;;  %v123_v12 = vld [vmem:[#allocation5 + $0x260] sm:$0xff] }
  0x25   :  { %231 = vmatpush.msra.mxu1 %v67_v47  ;;  %212 = vmatpush.msra.mxu0 %v50_v49  ;;  %v140_v13 = vld [vmem:[#allocation5 + $0x2e8] sm:$0xff]  ;;  %v45_v14 = vld [vmem:[#allocation2] sm:$0xff]  ;;  %v154_v15 = vld [vmem:[#allocation5 + $0x358] sm:$0xff] }
  0x26   :  { %272 = vmatpush.msra.mxu3 %v98_v50  ;;  %253 = vmatpush.msra.mxu2 %v81_v52  ;;  %v171_v16 = vld [vmem:[#allocation5 + $0x3e0] sm:$0xff]  ;;  %181 = vst [vmem:[#allocation1] ss:$4 sm:$0xff] %v45_v14  ;;  %v122_v17 = vld [vmem:[#allocation5 + $0x258] sm:$0xff]  ;;  %v153_v19 = vld [vmem:[#allocation5 + $0x350] sm:$0xff] }
  0x27   :  { %232 = vmatpush.msra.mxu1 %v66_v51  ;;  %213 = vmatpush.msra.mxu0 %v49_v53  ;;  %v139_v18 = vld [vmem:[#allocation5 + $0x2e0] sm:$0xff]  ;;  %v170_v20 = vld [vmem:[#allocation5 + $0x3d8] sm:$0xff]  ;;  %v121_v21 = vld [vmem:[#allocation5 + $0x250] sm:$0xff] }
  0x28   :  { %273 = vmatpush.msra.mxu3 %v97_v54  ;;  %254 = vmatpush.msra.mxu2 %v80_v56  ;;  %v138_v22 = vld [vmem:[#allocation5 + $0x2d8] sm:$0xff]  ;;  %v152_v23 = vld [vmem:[#allocation5 + $0x348] sm:$0xff]  ;;  %v169_v24 = vld [vmem:[#allocation5 + $0x3d0] sm:$0xff] }
  0x29   :  { %233 = vmatpush.msra.mxu1 %v65_v55  ;;  %214 = vmatpush.msra.mxu0 %v48_v57  ;;  %v46_v25 = vld [vmem:[#allocation2 + $0x8] sm:$0xff]  ;;  %v120_v26 = vld [vmem:[#allocation5 + $0x248] sm:$0xff]  ;;  %v137_v27 = vld [vmem:[#allocation5 + $0x2d0] sm:$0xff] }
  0x2a   :  { %274 = vmatpush.msra.mxu3 %v96_v58  ;;  %255 = vmatpush.msra.mxu2 %v79_v60  ;;  %183 = vst [vmem:[#allocation1 + $0x20] ss:$4 sm:$0xff] %v46_v25  ;;  %v151_v28 = vld [vmem:[#allocation5 + $0x340] sm:$0xff]  ;;  %v168_v29 = vld [vmem:[#allocation5 + $0x3c8] sm:$0xff]  ;;  %v150_v32 = vld [vmem:[#allocation5 + $0x338] sm:$0xff] }
  0x2b   :  { %234 = vmatpush.msra.mxu1 %v64_v59  ;;  %215 = vmatpush.msra.mxu0 %v47_v61  ;;  %v119_v30 = vld [vmem:[#allocation5 + $0x240] sm:$0xff]  ;;  %v136_v31 = vld [vmem:[#allocation5 + $0x2c8] sm:$0xff]  ;;  %v118_v34 = vld [vmem:[#allocation5 + $0x238] sm:$0xff] }
  0x2c   :  { %320 = vmatpush.msrb.mxu2 %v158_v62  ;;  %275 = vmatpush.msra.mxu3 %v95_v63  ;;  %v167_v33 = vld [vmem:[#allocation5 + $0x3c0] sm:$0xff]  ;;  %v149_v36 = vld [vmem:[#allocation5 + $0x330] sm:$0xff]  ;;  %v166_v37 = vld [vmem:[#allocation5 + $0x3b8] sm:$0xff] }
  0x2d   :  { %280 = vmatpush.msrb.mxu0 %v126_v0  ;;  %235 = vmatpush.msra.mxu1 %v63_v3  ;;  %v135_v35 = vld [vmem:[#allocation5 + $0x2c0] sm:$0xff]  ;;  %v117_v38 = vld [vmem:[#allocation5 + $0x230] sm:$0xff]  ;;  %v134_v39 = vld [vmem:[#allocation5 + $0x2b8] sm:$0xff] }
  0x2e   :  { %340 = vmatpush.msrb.mxu3 %v174_v1  ;;  %321 = vmatpush.msrb.mxu2 %v157_v2  ;;  %v148_v40 = vld [vmem:[#allocation5 + $0x328] sm:$0xff]  ;;  %v165_v41 = vld [vmem:[#allocation5 + $0x3b0] sm:$0xff]  ;;  %v147_v44 = vld [vmem:[#allocation5 + $0x320] sm:$0xff] }
  0x2f   :  { %281 = vmatpush.msrb.mxu0 %v125_v4  ;;  %300 = vmatpush.msrb.mxu1 %v142_v5  ;;  %v116_v42 = vld [vmem:[#allocation5 + $0x228] sm:$0xff]  ;;  %v133_v43 = vld [vmem:[#allocation5 + $0x2b0] sm:$0xff]  ;;  %v186_v46 = vld.sshfl [vmem:[#allocation1 + $0x10] sm:$0xff pattern:$0x73625140] }
  0x30   :  { %322 = vmatpush.msrb.mxu2 %v156_v6  ;;  %341 = vmatpush.msrb.mxu3 %v173_v7  ;;  %v164_v45 = vld [vmem:[#allocation5 + $0x3a8] sm:$0xff]  ;;  %v115_v47 = vld [vmem:[#allocation5 + $0x220] sm:$0xff]  ;;  %v146_v49 = vld [vmem:[#allocation5 + $0x318] sm:$0xff] }
  0x31   :  { %282 = vmatpush.msrb.mxu0 %v124_v8  ;;  %301 = vmatpush.msrb.mxu1 %v141_v9  ;;  %v132_v48 = vld [vmem:[#allocation5 + $0x2a8] sm:$0xff]  ;;  %v163_v50 = vld [vmem:[#allocation5 + $0x3a0] sm:$0xff]  ;;  %v114_v53 = vld [vmem:[#allocation5 + $0x218] sm:$0xff] }
  0x32   :  { %323 = vmatpush.msrb.mxu2 %v155_v10  ;;  %342 = vmatpush.msrb.mxu3 %v172_v11  ;;  %v184_v51 = vld.sshfl [vmem:[#allocation1] sm:$0xff pattern:$0x73625140]  ;;  %v187_v52 = vld.sshfl [vmem:[#allocation1 + $0x18] sm:$0xff pattern:$0x73625140] }
  0x33   :  { %283 = vmatpush.msrb.mxu0 %v123_v12  ;;  %302 = vmatpush.msrb.mxu1 %v140_v13  ;;  %v131_v54 = vld [vmem:[#allocation5 + $0x2a0] sm:$0xff]  ;;  %v145_v55 = vld [vmem:[#allocation5 + $0x310] sm:$0xff]  ;;  %v162_v56 = vld [vmem:[#allocation5 + $0x398] sm:$0xff] }
  0x34   :  { %324 = vmatpush.msrb.mxu2 %v154_v15  ;;  %343 = vmatpush.msrb.mxu3 %v171_v16  ;;  %v185_v57 = vld.sshfl [vmem:[#allocation1 + $0x8] sm:$0xff pattern:$0x73625140]  ;;  %v130_v59 = vld [vmem:[#allocation5 + $0x298] sm:$0xff]  ;;  %v144_v60 = vld [vmem:[#allocation5 + $0x308] sm:$0xff] }
  0x35   :  { %284 = vmatpush.msrb.mxu0 %v122_v17  ;;  %303 = vmatpush.msrb.mxu1 %v139_v18  ;;  %v113_v58 = vld [vmem:[#allocation5 + $0x210] sm:$0xff]  ;;  %v112_v62 = vld [vmem:[#allocation5 + $0x208] sm:$0xff]  ;;  %v143_v0 = vld [vmem:[#allocation5 + $0x300] sm:$0xff] }
  0x36   :  { %325 = vmatpush.msrb.mxu2 %v153_v19  ;;  %344 = vmatpush.msrb.mxu3 %v170_v20  ;;  %v161_v61 = vld [vmem:[#allocation5 + $0x390] sm:$0xff]  ;;  %v160_v1 = vld [vmem:[#allocation5 + $0x388] sm:$0xff]  ;;  %v190_v2 = vld.sshfl [vmem:[#allocation1 + $0x30] sm:$0xff pattern:$0x73625140] }
  0x37   :  { %285 = vmatpush.msrb.mxu0 %v121_v21  ;;  %304 = vmatpush.msrb.mxu1 %v138_v22  ;;  %v129_v63 = vld [vmem:[#allocation5 + $0x290] sm:$0xff]  ;;  %v111_v3 = vld [vmem:[#allocation5 + $0x200] sm:$0xff]  ;;  %v128_v4 = vld [vmem:[#allocation5 + $0x288] sm:$0xff] }
  0x38   :  { %326 = vmatpush.msrb.mxu2 %v152_v23  ;;  %345 = vmatpush.msrb.mxu3 %v169_v24  ;;  %v159_v5 = vld [vmem:[#allocation5 + $0x380] sm:$0xff]  ;;  %v188_v6 = vld.sshfl [vmem:[#allocation1 + $0x20] sm:$0xff pattern:$0x73625140] }
  0x39   :  { %286 = vmatpush.msrb.mxu0 %v120_v26  ;;  %305 = vmatpush.msrb.mxu1 %v137_v27  ;;  %v191_v7 = vld.sshfl [vmem:[#allocation1 + $0x38] sm:$0xff pattern:$0x73625140]  ;;  %v189_v9 = vld.sshfl [vmem:[#allocation1 + $0x28] sm:$0xff pattern:$0x73625140] }
  0x3a   :  { %327 = vmatpush.msrb.mxu2 %v151_v28  ;;  %346 = vmatpush.msrb.mxu3 %v168_v29  ;;  %v127_v8 = vld [vmem:[#allocation5 + $0x280] sm:$0xff]  ;;  %v391_v10 = vld [vmem:[%s511_s2] ss:$0 sm:$0xff]  ;;  %s476_s2 = smov [#allocation7]  }
  0x3b   :  { %287 = vmatpush.msrb.mxu0 %v119_v30  ;;  %306 = vmatpush.msrb.mxu1 %v136_v31  ;;  %s372_s24 = sshll.u32 %s476_s2, 4  ;;  %s373_s24 = int_to_ptr.vmem [resolvable:$true] %s372_s24 }
  0x3c   :  { %328 = vmatpush.msrb.mxu2 %v150_v32  ;;  %347 = vmatpush.msrb.mxu3 %v167_v33 }
  0x3d   :  { %288 = vmatpush.msrb.mxu0 %v118_v34  ;;  %307 = vmatpush.msrb.mxu1 %v135_v35 }
  0x3e   :  { %329 = vmatpush.msrb.mxu2 %v149_v36  ;;  %348 = vmatpush.msrb.mxu3 %v166_v37 }
  0x3f   :  { %289 = vmatpush.msrb.mxu0 %v117_v38  ;;  %308 = vmatpush.msrb.mxu1 %v134_v39 }
  0x40   :  { %330 = vmatpush.msrb.mxu2 %v148_v40  ;;  %349 = vmatpush.msrb.mxu3 %v165_v41 }
  0x41   :  { %290 = vmatpush.msrb.mxu0 %v116_v42  ;;  %309 = vmatpush.msrb.mxu1 %v133_v43 }
  0x42   :  { %331 = vmatpush.msrb.mxu2 %v147_v44  ;;  %350 = vmatpush.msrb.mxu3 %v164_v45 }
  0x43   :  { %256 = vmatmul.f32.vlgmr.msra.gmra.mxu2 %v186_v46  ;;  %291 = vmatpush.msrb.mxu0 %v115_v47 }
  0x44   :  { %310 = vmatpush.msrb.mxu1 %v132_v48  ;;  %332 = vmatpush.msrb.mxu2 %v146_v49 }
  0x45   :  { %351 = vmatpush.msrb.mxu3 %v163_v50  ;;  %216 = vmatmul.f32.vlgmr.msra.gmra.mxu0 %v184_v51 }
  0x46   :  { %276 = vmatmul.f32.vlgmr.msra.gmra.mxu3 %v187_v52  ;;  %292 = vmatpush.msrb.mxu0 %v114_v53 }
  0x47   :  { %311 = vmatpush.msrb.mxu1 %v131_v54  ;;  %333 = vmatpush.msrb.mxu2 %v145_v55 }
  0x48   :  { %352 = vmatpush.msrb.mxu3 %v162_v56  ;;  %236 = vmatmul.f32.vlgmr.msra.gmra.mxu1 %v185_v57 }
  0x49   :  { %293 = vmatpush.msrb.mxu0 %v113_v58  ;;  %312 = vmatpush.msrb.mxu1 %v130_v59 }
  0x4a   :  { %334 = vmatpush.msrb.mxu2 %v144_v60  ;;  %353 = vmatpush.msrb.mxu3 %v161_v61 }
  0x4b   :  { %294 = vmatpush.msrb.mxu0 %v112_v62  ;;  %313 = vmatpush.msrb.mxu1 %v129_v63 }
  0x4c   :  { %335 = vmatpush.msrb.mxu2 %v143_v0  ;;  %354 = vmatpush.msrb.mxu3 %v160_v1 }
  0x4d   :  { %336 = vmatmul.f32.vlgmr.msrb.gmra.mxu2 %v190_v2  ;;  %295 = vmatpush.msrb.mxu0 %v111_v3 }
  0x4e   :  { %314 = vmatpush.msrb.mxu1 %v128_v4  ;;  %355 = vmatpush.msrb.mxu3 %v159_v5 }
  0x4f   :  { %296 = vmatmul.f32.vlgmr.msrb.gmra.mxu0 %v188_v6  ;;  %356 = vmatmul.f32.vlgmr.msrb.gmra.mxu3 %v191_v7 }
  0x50   :  { %315 = vmatpush.msrb.mxu1 %v127_v8 }
  0x51   :  { %316 = vmatmul.f32.vlgmr.msrb.gmra.mxu1 %v189_v9 }
  0xc2   :  { %v217_v11 = vpop.f32.mrf.mxu0 }
  0xc3   :  { %v218_v12 = vadd.f32 %v391_v10, %v217_v11 }
  0xc5   :  { %v237_v13 = vpop.f32.mrf.mxu1 }
  0xc6   :  { %v238_v14 = vadd.f32 %v237_v13, %v218_v12  ;;  %v257_v15 = vpop.f32.mrf.mxu2 }
  0xc8   :  { %v258_v16 = vadd.f32 %v257_v15, %v238_v14 }
  0xc9   :  { %v277_v17 = vpop.f32.mrf.mxu3 }
  0xca   :  { %v278_v18 = vadd.f32 %v277_v17, %v258_v16 }
  0xcc   :  { %v297_v19 = vpop.f32.mrf.mxu0 }
  0xcd   :  { %v298_v20 = vadd.f32 %v297_v19, %v278_v18 }
  0xce   :  { %v317_v21 = vpop.f32.mrf.mxu1 }
  0xcf   :  { %v318_v22 = vadd.f32 %v317_v21, %v298_v20 }
  0xd0   :  { %v337_v23 = vpop.f32.mrf.mxu2 }
  0xd1   :  { %v338_v24 = vadd.f32 %v337_v23, %v318_v22 }
  0xd2   :  { %v357_v25 = vpop.f32.mrf.mxu3 }
  0xd3   :  { %v358_v26 = vadd.f32 %v357_v25, %v338_v24 }
  0xd5   :  { %v360_v27 = vmin.f32 %v358_v26, 0.0  ;;  %vm364_vm0 = vcmp.gt.f32.partialorder %v358_v26, 0.0 }
  0xd7   :  { %v361_v28 = vmul.f32 1.442695, %v360_v27 }
  0xd9   :  { %392 = vpow2.f32 %v361_v28 }
  0xdf   :  { %v393_v29 = vpop.eup %392 }
  0xe0   :  { %v385_v30 = vadd.f32 -1.0, %v393_v29 }
  0xe2   :  { %v365_v31 = vsel %vm364_vm0, %v358_v26, %v385_v30 }
  0xe3   :  { %366 = vst [vmem:[#allocation7] sm:$0x3] %v365_v31 }
  0xe4   :  { %377 = dma.vmem_to_hbm [thread:$0]  %s373_s24, 32, %s375_s27, [#allocation4]  }
  0xe5   :  { %470 = dma.done.wait [#allocation4], 32  }
  0xe6   :  { %471 = vsyncadd [#allocation4], 4294967264 }
  0xe7   :  { %382 = vsyncpa [#allocation3], 1 }
  0xe8   :  { %383 = vsyncpa [#allocation6], 1 }
  0xe9   :  { %384 = vsyncpa [#allocation4], 1 }

// kernel: tpu_custom_call.1
= control target key start
LH: loop header
LB: loop body
LE: loop exit
PB: predicated region body
PF: predicated region fallthrough
CT: control target
= control target key end

     0   :  { %8 = vsyncpa [#allocation3], 0  ;;  %s509_s0 = inlined_call_operand.hbm [shape: f32[2,1024], index: 0, kind: input, shape index: {}]   ;;  %s510_s1 = inlined_call_operand.hbm [shape: f32[1024,128], index: 1, kind: input, shape index: {}]   ;;  %s511_s2 = inlined_call_operand.vmem [shape: f32[1,128], index: 2, kind: input, shape index: {}]   ;;  %s512_s3 = inlined_call_operand.hbm [shape: f32[2,128], index: 3, kind: output, shape index: {}]  }
   0x1   :  { %9 = vsyncpa [#allocation6], 0 }
   0x2   :  { %10 = vsyncpa [#allocation4], 0  ;;  %s16_s14 = sshll.u32 %s509_s0, 4  ;;  %s472_s15 = smov [#allocation2]   ;;  %s17_s14 = int_to_ptr.hbm [resolvable:$true] %s16_s14 }
   0x3   :  { %s18_s16 = sshll.u32 %s472_s15, 4  ;;  %s26_s19 = sshll.u32 %s510_s1, 4  ;;  %s19_s16 = int_to_ptr.vmem [resolvable:$true] %s18_s16  ;;  %s27_s19 = int_to_ptr.hbm [resolvable:$true] %s26_s19 }
   0x4   :  { %21 = dma.hbm_to_vmem [thread:$0]  %s17_s14, 256, %s19_s16, [#allocation3]  }
   0x5   :  { %s473_s20 = smov [#allocation5]   ;;  %s474_s22 = smov 128  }
   0x6   :  { %s28_s21 = sshll.u32 %s473_s20, 4  ;;  %s475_s23 = smov 8   ;;  %s29_s21 = int_to_ptr.vmem [resolvable:$true] %s28_s21 }
   0x7   :  { %34 = dma.hbm_to_vmem [thread:$0]  %s27_s19, 16384, %s29_s21, [#allocation6], %s474_s22, %s474_s22, %s475_s23  }
   0x8   :  { %466 = dma.done.wait [#allocation3], 256  }
   0x9   :  { %467 = vsyncadd [#allocation3], 4294967040 }
   0xa   :  { %468 = dma.done.wait [#allocation6], 16384  }
   0xb   :  { %469 = vsyncadd [#allocation6], 4294950912  ;;  %v94_v0 = vld [vmem:[#allocation5 + $0x178] sm:$0xff]  ;;  %v93_v2 = vld [vmem:[#allocation5 + $0x170] sm:$0xff]  ;;  %s374_s27 = sshll.u32 %s512_s3, 4  ;;  %s375_s27 = int_to_ptr.hbm [resolvable:$true] %s374_s27 }
   0xc   :  { %v62_v1 = vld [vmem:[#allocation5 + $0x78] sm:$0xff]  ;;  %240 = vmatpush.msra.mxu2 %v94_v0  ;;  %v61_v4 = vld [vmem:[#allocation5 + $0x70] sm:$0xff]  ;;  %v92_v6 = vld [vmem:[#allocation5 + $0x168] sm:$0xff] }
   0xd   :  { %200 = vmatpush.msra.mxu0 %v62_v1  ;;  %v110_v3 = vld [vmem:[#allocation5 + $0x1f8] sm:$0xff]  ;;  %v109_v7 = vld [vmem:[#allocation5 + $0x1f0] sm:$0xff]  ;;  %v60_v8 = vld [vmem:[#allocation5 + $0x68] sm:$0xff] }
   0xe   :  { %v78_v5 = vld [vmem:[#allocation5 + $0xf8] sm:$0xff]  ;;  %260 = vmatpush.msra.mxu3 %v110_v3  ;;  %241 = vmatpush.msra.mxu2 %v93_v2  ;;  %v77_v9 = vld [vmem:[#allocation5 + $0xf0] sm:$0xff]  ;;  %v108_v10 = vld [vmem:[#allocation5 + $0x1e8] sm:$0xff] }
   0xf   :  { %220 = vmatpush.msra.mxu1 %v78_v5  ;;  %201 = vmatpush.msra.mxu0 %v61_v4  ;;  %v91_v11 = vld [vmem:[#allocation5 + $0x160] sm:$0xff]  ;;  %v76_v13 = vld [vmem:[#allocation5 + $0xe8] sm:$0xff]  ;;  %v90_v16 = vld [vmem:[#allocation5 + $0x158] sm:$0xff] }
  0x10   :  { %261 = vmatpush.msra.mxu3 %v109_v7  ;;  %v59_v12 = vld [vmem:[#allocation5 + $0x60] sm:$0xff]  ;;  %242 = vmatpush.msra.mxu2 %v92_v6  ;;  %v58_v17 = vld [vmem:[#allocation5 + $0x58] sm:$0xff]  ;;  %v89_v20 = vld [vmem:[#allocation5 + $0x150] sm:$0xff] }
  0x11   :  { %221 = vmatpush.msra.mxu1 %v77_v9  ;;  %202 = vmatpush.msra.mxu0 %v60_v8  ;;  %v107_v14 = vld [vmem:[#allocation5 + $0x1e0] sm:$0xff]  ;;  %v106_v18 = vld [vmem:[#allocation5 + $0x1d8] sm:$0xff]  ;;  %v57_v21 = vld [vmem:[#allocation5 + $0x50] sm:$0xff] }
  0x12   :  { %v75_v15 = vld [vmem:[#allocation5 + $0xe0] sm:$0xff]  ;;  %262 = vmatpush.msra.mxu3 %v108_v10  ;;  %243 = vmatpush.msra.mxu2 %v91_v11  ;;  %v74_v19 = vld [vmem:[#allocation5 + $0xd8] sm:$0xff]  ;;  %v105_v22 = vld [vmem:[#allocation5 + $0x1d0] sm:$0xff] }
  0x13   :  { %222 = vmatpush.msra.mxu1 %v76_v13  ;;  %203 = vmatpush.msra.mxu0 %v59_v12  ;;  %v73_v23 = vld [vmem:[#allocation5 + $0xd0] sm:$0xff]  ;;  %v88_v24 = vld [vmem:[#allocation5 + $0x148] sm:$0xff]  ;;  %v87_v28 = vld [vmem:[#allocation5 + $0x140] sm:$0xff] }
  0x14   :  { %263 = vmatpush.msra.mxu3 %v107_v14  ;;  %244 = vmatpush.msra.mxu2 %v90_v16  ;;  %v56_v25 = vld [vmem:[#allocation5 + $0x48] sm:$0xff]  ;;  %v55_v29 = vld [vmem:[#allocation5 + $0x40] sm:$0xff]  ;;  %v86_v32 = vld [vmem:[#allocation5 + $0x138] sm:$0xff] }
  0x15   :  { %223 = vmatpush.msra.mxu1 %v75_v15  ;;  %204 = vmatpush.msra.mxu0 %v58_v17  ;;  %v104_v26 = vld [vmem:[#allocation5 + $0x1c8] sm:$0xff]  ;;  %v103_v30 = vld [vmem:[#allocation5 + $0x1c0] sm:$0xff]  ;;  %v54_v33 = vld [vmem:[#allocation5 + $0x38] sm:$0xff] }
  0x16   :  { %264 = vmatpush.msra.mxu3 %v106_v18  ;;  %245 = vmatpush.msra.mxu2 %v89_v20  ;;  %v72_v27 = vld [vmem:[#allocation5 + $0xc8] sm:$0xff]  ;;  %v71_v31 = vld [vmem:[#allocation5 + $0xc0] sm:$0xff]  ;;  %v102_v34 = vld [vmem:[#allocation5 + $0x1b8] sm:$0xff] }
  0x17   :  { %224 = vmatpush.msra.mxu1 %v74_v19  ;;  %205 = vmatpush.msra.mxu0 %v57_v21  ;;  %v70_v35 = vld [vmem:[#allocation5 + $0xb8] sm:$0xff]  ;;  %v85_v36 = vld [vmem:[#allocation5 + $0x130] sm:$0xff]  ;;  %v84_v40 = vld [vmem:[#allocation5 + $0x128] sm:$0xff] }
  0x18   :  { %265 = vmatpush.msra.mxu3 %v105_v22  ;;  %246 = vmatpush.msra.mxu2 %v88_v24  ;;  %v53_v37 = vld [vmem:[#allocation5 + $0x30] sm:$0xff]  ;;  %v52_v41 = vld [vmem:[#allocation5 + $0x28] sm:$0xff]  ;;  %v83_v44 = vld [vmem:[#allocation5 + $0x120] sm:$0xff] }
  0x19   :  { %225 = vmatpush.msra.mxu1 %v73_v23  ;;  %206 = vmatpush.msra.mxu0 %v56_v25  ;;  %v101_v38 = vld [vmem:[#allocation5 + $0x1b0] sm:$0xff]  ;;  %v100_v42 = vld [vmem:[#allocation5 + $0x1a8] sm:$0xff]  ;;  %v51_v45 = vld [vmem:[#allocation5 + $0x20] sm:$0xff] }
  0x1a   :  { %266 = vmatpush.msra.mxu3 %v104_v26  ;;  %247 = vmatpush.msra.mxu2 %v87_v28  ;;  %v69_v39 = vld [vmem:[#allocation5 + $0xb0] sm:$0xff]  ;;  %v68_v43 = vld [vmem:[#allocation5 + $0xa8] sm:$0xff]  ;;  %v99_v46 = vld [vmem:[#allocation5 + $0x1a0] sm:$0xff] }
  0x1b   :  { %226 = vmatpush.msra.mxu1 %v72_v27  ;;  %207 = vmatpush.msra.mxu0 %v55_v29  ;;  %v67_v47 = vld [vmem:[#allocation5 + $0xa0] sm:$0xff]  ;;  %v82_v48 = vld [vmem:[#allocation5 + $0x118] sm:$0xff]  ;;  %v81_v52 = vld [vmem:[#allocation5 + $0x110] sm:$0xff] }
  0x1c   :  { %267 = vmatpush.msra.mxu3 %v103_v30  ;;  %248 = vmatpush.msra.mxu2 %v86_v32  ;;  %v50_v49 = vld [vmem:[#allocation5 + $0x18] sm:$0xff]  ;;  %v49_v53 = vld [vmem:[#allocation5 + $0x10] sm:$0xff]  ;;  %v80_v56 = vld [vmem:[#allocation5 + $0x108] sm:$0xff] }
  0x1d   :  { %227 = vmatpush.msra.mxu1 %v71_v31  ;;  %208 = vmatpush.msra.mxu0 %v54_v33  ;;  %v98_v50 = vld [vmem:[#allocation5 + $0x198] sm:$0xff]  ;;  %v97_v54 = vld [vmem:[#allocation5 + $0x190] sm:$0xff]  ;;  %v48_v57 = vld [vmem:[#allocation5 + $0x8] sm:$0xff] }
  0x1e   :  { %268 = vmatpush.msra.mxu3 %v102_v34  ;;  %249 = vmatpush.msra.mxu2 %v85_v36  ;;  %v66_v51 = vld [vmem:[#allocation5 + $0x98] sm:$0xff]  ;;  %v65_v55 = vld [vmem:[#allocation5 + $0x90] sm:$0xff]  ;;  %v96_v58 = vld [vmem:[#allocation5 + $0x188] sm:$0xff] }
  0x1f   :  { %228 = vmatpush.msra.mxu1 %v70_v35  ;;  %209 = vmatpush.msra.mxu0 %v53_v37  ;;  %v64_v59 = vld [vmem:[#allocation5 + $0x88] sm:$0xff]  ;;  %v79_v60 = vld [vmem:[#allocation5 + $0x100] sm:$0xff]  ;;  %v158_v62 = vld [vmem:[#allocation5 + $0x378] sm:$0xff] }
  0x20   :  { %269 = vmatpush.msra.mxu3 %v101_v38  ;;  %250 = vmatpush.msra.mxu2 %v84_v40  ;;  %v47_v61 = vld [vmem:[#allocation5] sm:$0xff]  ;;  %v126_v0 = vld [vmem:[#allocation5 + $0x278] sm:$0xff]  ;;  %v157_v2 = vld [vmem:[#allocation5 + $0x370] sm:$0xff] }
  0x21   :  { %229 = vmatpush.msra.mxu1 %v69_v39  ;;  %210 = vmatpush.msra.mxu0 %v52_v41  ;;  %v95_v63 = vld [vmem:[#allocation5 + $0x180] sm:$0xff]  ;;  %v174_v1 = vld [vmem:[#allocation5 + $0x3f8] sm:$0xff]  ;;  %v125_v4 = vld [vmem:[#allocation5 + $0x270] sm:$0xff] }
  0x22   :  { %270 = vmatpush.msra.mxu3 %v100_v42  ;;  %251 = vmatpush.msra.mxu2 %v83_v44  ;;  %v63_v3 = vld [vmem:[#allocation5 + $0x80] sm:$0xff]  ;;  %v142_v5 = vld [vmem:[#allocation5 + $0x2f8] sm:$0xff]  ;;  %v156_v6 = vld [vmem:[#allocation5 + $0x368] sm:$0xff] }
  0x23   :  { %230 = vmatpush.msra.mxu1 %v68_v43  ;;  %211 = vmatpush.msra.mxu0 %v51_v45  ;;  %v173_v7 = vld [vmem:[#allocation5 + $0x3f0] sm:$0xff]  ;;  %v124_v8 = vld [vmem:[#allocation5 + $0x268] sm:$0xff]  ;;  %v155_v10 = vld [vmem:[#allocation5 + $0x360] sm:$0xff] }
  0x24   :  { %271 = vmatpush.msra.mxu3 %v99_v46  ;;  %252 = vmatpush.msra.mxu2 %v82_v48  ;;  %v141_v9 = vld [vmem:[#allocation5 + $0x2f0] sm:$0xff]  ;;  %v172_v11 = vld [vmem:[#allocation5 + $0x3e8] sm:$0xff]  ;;  %v123_v12 = vld [vmem:[#allocation5 + $0x260] sm:$0xff] }
  0x25   :  { %231 = vmatpush.msra.mxu1 %v67_v47  ;;  %212 = vmatpush.msra.mxu0 %v50_v49  ;;  %v140_v13 = vld [vmem:[#allocation5 + $0x2e8] sm:$0xff]  ;;  %v45_v14 = vld [vmem:[#allocation2] sm:$0xff]  ;;  %v154_v15 = vld [vmem:[#allocation5 + $0x358] sm:$0xff] }
  0x26   :  { %272 = vmatpush.msra.mxu3 %v98_v50  ;;  %253 = vmatpush.msra.mxu2 %v81_v52  ;;  %v171_v16 = vld [vmem:[#allocation5 + $0x3e0] sm:$0xff]  ;;  %181 = vst [vmem:[#allocation1] ss:$4 sm:$0xff] %v45_v14  ;;  %v122_v17 = vld [vmem:[#allocation5 + $0x258] sm:$0xff]  ;;  %v153_v19 = vld [vmem:[#allocation5 + $0x350] sm:$0xff] }
  0x27   :  { %232 = vmatpush.msra.mxu1 %v66_v51  ;;  %213 = vmatpush.msra.mxu0 %v49_v53  ;;  %v139_v18 = vld [vmem:[#allocation5 + $0x2e0] sm:$0xff]  ;;  %v170_v20 = vld [vmem:[#allocation5 + $0x3d8] sm:$0xff]  ;;  %v121_v21 = vld [vmem:[#allocation5 + $0x250] sm:$0xff] }
  0x28   :  { %273 = vmatpush.msra.mxu3 %v97_v54  ;;  %254 = vmatpush.msra.mxu2 %v80_v56  ;;  %v138_v22 = vld [vmem:[#allocation5 + $0x2d8] sm:$0xff]  ;;  %v152_v23 = vld [vmem:[#allocation5 + $0x348] sm:$0xff]  ;;  %v169_v24 = vld [vmem:[#allocation5 + $0x3d0] sm:$0xff] }
  0x29   :  { %233 = vmatpush.msra.mxu1 %v65_v55  ;;  %214 = vmatpush.msra.mxu0 %v48_v57  ;;  %v46_v25 = vld [vmem:[#allocation2 + $0x8] sm:$0xff]  ;;  %v120_v26 = vld [vmem:[#allocation5 + $0x248] sm:$0xff]  ;;  %v137_v27 = vld [vmem:[#allocation5 + $0x2d0] sm:$0xff] }
  0x2a   :  { %274 = vmatpush.msra.mxu3 %v96_v58  ;;  %255 = vmatpush.msra.mxu2 %v79_v60  ;;  %183 = vst [vmem:[#allocation1 + $0x20] ss:$4 sm:$0xff] %v46_v25  ;;  %v151_v28 = vld [vmem:[#allocation5 + $0x340] sm:$0xff]  ;;  %v168_v29 = vld [vmem:[#allocation5 + $0x3c8] sm:$0xff]  ;;  %v150_v32 = vld [vmem:[#allocation5 + $0x338] sm:$0xff] }
  0x2b   :  { %234 = vmatpush.msra.mxu1 %v64_v59  ;;  %215 = vmatpush.msra.mxu0 %v47_v61  ;;  %v119_v30 = vld [vmem:[#allocation5 + $0x240] sm:$0xff]  ;;  %v136_v31 = vld [vmem:[#allocation5 + $0x2c8] sm:$0xff]  ;;  %v118_v34 = vld [vmem:[#allocation5 + $0x238] sm:$0xff] }
  0x2c   :  { %320 = vmatpush.msrb.mxu2 %v158_v62  ;;  %275 = vmatpush.msra.mxu3 %v95_v63  ;;  %v167_v33 = vld [vmem:[#allocation5 + $0x3c0] sm:$0xff]  ;;  %v149_v36 = vld [vmem:[#allocation5 + $0x330] sm:$0xff]  ;;  %v166_v37 = vld [vmem:[#allocation5 + $0x3b8] sm:$0xff] }
  0x2d   :  { %280 = vmatpush.msrb.mxu0 %v126_v0  ;;  %235 = vmatpush.msra.mxu1 %v63_v3  ;;  %v135_v35 = vld [vmem:[#allocation5 + $0x2c0] sm:$0xff]  ;;  %v117_v38 = vld [vmem:[#allocation5 + $0x230] sm:$0xff]  ;;  %v134_v39 = vld [vmem:[#allocation5 + $0x2b8] sm:$0xff] }
  0x2e   :  { %340 = vmatpush.msrb.mxu3 %v174_v1  ;;  %321 = vmatpush.msrb.mxu2 %v157_v2  ;;  %v148_v40 = vld [vmem:[#allocation5 + $0x328] sm:$0xff]  ;;  %v165_v41 = vld [vmem:[#allocation5 + $0x3b0] sm:$0xff]  ;;  %v147_v44 = vld [vmem:[#allocation5 + $0x320] sm:$0xff] }
  0x2f   :  { %281 = vmatpush.msrb.mxu0 %v125_v4  ;;  %300 = vmatpush.msrb.mxu1 %v142_v5  ;;  %v116_v42 = vld [vmem:[#allocation5 + $0x228] sm:$0xff]  ;;  %v133_v43 = vld [vmem:[#allocation5 + $0x2b0] sm:$0xff]  ;;  %v186_v46 = vld.sshfl [vmem:[#allocation1 + $0x10] sm:$0xff pattern:$0x73625140] }
  0x30   :  { %322 = vmatpush.msrb.mxu2 %v156_v6  ;;  %341 = vmatpush.msrb.mxu3 %v173_v7  ;;  %v164_v45 = vld [vmem:[#allocation5 + $0x3a8] sm:$0xff]  ;;  %v115_v47 = vld [vmem:[#allocation5 + $0x220] sm:$0xff]  ;;  %v146_v49 = vld [vmem:[#allocation5 + $0x318] sm:$0xff] }
  0x31   :  { %282 = vmatpush.msrb.mxu0 %v124_v8  ;;  %301 = vmatpush.msrb.mxu1 %v141_v9  ;;  %v132_v48 = vld [vmem:[#allocation5 + $0x2a8] sm:$0xff]  ;;  %v163_v50 = vld [vmem:[#allocation5 + $0x3a0] sm:$0xff]  ;;  %v114_v53 = vld [vmem:[#allocation5 + $0x218] sm:$0xff] }
  0x32   :  { %323 = vmatpush.msrb.mxu2 %v155_v10  ;;  %342 = vmatpush.msrb.mxu3 %v172_v11  ;;  %v184_v51 = vld.sshfl [vmem:[#allocation1] sm:$0xff pattern:$0x73625140]  ;;  %v187_v52 = vld.sshfl [vmem:[#allocation1 + $0x18] sm:$0xff pattern:$0x73625140] }
  0x33   :  { %283 = vmatpush.msrb.mxu0 %v123_v12  ;;  %302 = vmatpush.msrb.mxu1 %v140_v13  ;;  %v131_v54 = vld [vmem:[#allocation5 + $0x2a0] sm:$0xff]  ;;  %v145_v55 = vld [vmem:[#allocation5 + $0x310] sm:$0xff]  ;;  %v162_v56 = vld [vmem:[#allocation5 + $0x398] sm:$0xff] }
  0x34   :  { %324 = vmatpush.msrb.mxu2 %v154_v15  ;;  %343 = vmatpush.msrb.mxu3 %v171_v16  ;;  %v185_v57 = vld.sshfl [vmem:[#allocation1 + $0x8] sm:$0xff pattern:$0x73625140]  ;;  %v130_v59 = vld [vmem:[#allocation5 + $0x298] sm:$0xff]  ;;  %v144_v60 = vld [vmem:[#allocation5 + $0x308] sm:$0xff] }
  0x35   :  { %284 = vmatpush.msrb.mxu0 %v122_v17  ;;  %303 = vmatpush.msrb.mxu1 %v139_v18  ;;  %v113_v58 = vld [vmem:[#allocation5 + $0x210] sm:$0xff]  ;;  %v112_v62 = vld [vmem:[#allocation5 + $0x208] sm:$0xff]  ;;  %v143_v0 = vld [vmem:[#allocation5 + $0x300] sm:$0xff] }
  0x36   :  { %325 = vmatpush.msrb.mxu2 %v153_v19  ;;  %344 = vmatpush.msrb.mxu3 %v170_v20  ;;  %v161_v61 = vld [vmem:[#allocation5 + $0x390] sm:$0xff]  ;;  %v160_v1 = vld [vmem:[#allocation5 + $0x388] sm:$0xff]  ;;  %v190_v2 = vld.sshfl [vmem:[#allocation1 + $0x30] sm:$0xff pattern:$0x73625140] }
  0x37   :  { %285 = vmatpush.msrb.mxu0 %v121_v21  ;;  %304 = vmatpush.msrb.mxu1 %v138_v22  ;;  %v129_v63 = vld [vmem:[#allocation5 + $0x290] sm:$0xff]  ;;  %v111_v3 = vld [vmem:[#allocation5 + $0x200] sm:$0xff]  ;;  %v128_v4 = vld [vmem:[#allocation5 + $0x288] sm:$0xff] }
  0x38   :  { %326 = vmatpush.msrb.mxu2 %v152_v23  ;;  %345 = vmatpush.msrb.mxu3 %v169_v24  ;;  %v159_v5 = vld [vmem:[#allocation5 + $0x380] sm:$0xff]  ;;  %v188_v6 = vld.sshfl [vmem:[#allocation1 + $0x20] sm:$0xff pattern:$0x73625140] }
  0x39   :  { %286 = vmatpush.msrb.mxu0 %v120_v26  ;;  %305 = vmatpush.msrb.mxu1 %v137_v27  ;;  %v191_v7 = vld.sshfl [vmem:[#allocation1 + $0x38] sm:$0xff pattern:$0x73625140]  ;;  %v189_v9 = vld.sshfl [vmem:[#allocation1 + $0x28] sm:$0xff pattern:$0x73625140] }
  0x3a   :  { %327 = vmatpush.msrb.mxu2 %v151_v28  ;;  %346 = vmatpush.msrb.mxu3 %v168_v29  ;;  %v127_v8 = vld [vmem:[#allocation5 + $0x280] sm:$0xff]  ;;  %v391_v10 = vld [vmem:[%s511_s2] ss:$0 sm:$0xff]  ;;  %s476_s2 = smov [#allocation7]  }
  0x3b   :  { %287 = vmatpush.msrb.mxu0 %v119_v30  ;;  %306 = vmatpush.msrb.mxu1 %v136_v31  ;;  %s372_s24 = sshll.u32 %s476_s2, 4  ;;  %s373_s24 = int_to_ptr.vmem [resolvable:$true] %s372_s24 }
  0x3c   :  { %328 = vmatpush.msrb.mxu2 %v150_v32  ;;  %347 = vmatpush.msrb.mxu3 %v167_v33 }
  0x3d   :  { %288 = vmatpush.msrb.mxu0 %v118_v34  ;;  %307 = vmatpush.msrb.mxu1 %v135_v35 }
  0x3e   :  { %329 = vmatpush.msrb.mxu2 %v149_v36  ;;  %348 = vmatpush.msrb.mxu3 %v166_v37 }
  0x3f   :  { %289 = vmatpush.msrb.mxu0 %v117_v38  ;;  %308 = vmatpush.msrb.mxu1 %v134_v39 }
  0x40   :  { %330 = vmatpush.msrb.mxu2 %v148_v40  ;;  %349 = vmatpush.msrb.mxu3 %v165_v41 }
  0x41   :  { %290 = vmatpush.msrb.mxu0 %v116_v42  ;;  %309 = vmatpush.msrb.mxu1 %v133_v43 }
  0x42   :  { %331 = vmatpush.msrb.mxu2 %v147_v44  ;;  %350 = vmatpush.msrb.mxu3 %v164_v45 }
  0x43   :  { %256 = vmatmul.f32.vlgmr.msra.gmra.mxu2 %v186_v46  ;;  %291 = vmatpush.msrb.mxu0 %v115_v47 }
  0x44   :  { %310 = vmatpush.msrb.mxu1 %v132_v48  ;;  %332 = vmatpush.msrb.mxu2 %v146_v49 }
  0x45   :  { %351 = vmatpush.msrb.mxu3 %v163_v50  ;;  %216 = vmatmul.f32.vlgmr.msra.gmra.mxu0 %v184_v51 }
  0x46   :  { %276 = vmatmul.f32.vlgmr.msra.gmra.mxu3 %v187_v52  ;;  %292 = vmatpush.msrb.mxu0 %v114_v53 }
  0x47   :  { %311 = vmatpush.msrb.mxu1 %v131_v54  ;;  %333 = vmatpush.msrb.mxu2 %v145_v55 }
  0x48   :  { %352 = vmatpush.msrb.mxu3 %v162_v56  ;;  %236 = vmatmul.f32.vlgmr.msra.gmra.mxu1 %v185_v57 }
  0x49   :  { %293 = vmatpush.msrb.mxu0 %v113_v58  ;;  %312 = vmatpush.msrb.mxu1 %v130_v59 }
  0x4a   :  { %334 = vmatpush.msrb.mxu2 %v144_v60  ;;  %353 = vmatpush.msrb.mxu3 %v161_v61 }
  0x4b   :  { %294 = vmatpush.msrb.mxu0 %v112_v62  ;;  %313 = vmatpush.msrb.mxu1 %v129_v63 }
  0x4c   :  { %335 = vmatpush.msrb.mxu2 %v143_v0  ;;  %354 = vmatpush.msrb.mxu3 %v160_v1 }
  0x4d   :  { %336 = vmatmul.f32.vlgmr.msrb.gmra.mxu2 %v190_v2  ;;  %295 = vmatpush.msrb.mxu0 %v111_v3 }
  0x4e   :  { %314 = vmatpush.msrb.mxu1 %v128_v4  ;;  %355 = vmatpush.msrb.mxu3 %v159_v5 }
  0x4f   :  { %296 = vmatmul.f32.vlgmr.msrb.gmra.mxu0 %v188_v6  ;;  %356 = vmatmul.f32.vlgmr.msrb.gmra.mxu3 %v191_v7 }
  0x50   :  { %315 = vmatpush.msrb.mxu1 %v127_v8 }
  0x51   :  { %316 = vmatmul.f32.vlgmr.msrb.gmra.mxu1 %v189_v9 }
  0xc2   :  { %v217_v11 = vpop.f32.mrf.mxu0 }
  0xc3   :  { %v218_v12 = vadd.f32 %v391_v10, %v217_v11 }
  0xc5   :  { %v237_v13 = vpop.f32.mrf.mxu1 }
  0xc6   :  { %v238_v14 = vadd.f32 %v237_v13, %v218_v12  ;;  %v257_v15 = vpop.f32.mrf.mxu2 }
  0xc8   :  { %v258_v16 = vadd.f32 %v257_v15, %v238_v14 }
  0xc9   :  { %v277_v17 = vpop.f32.mrf.mxu3 }
  0xca   :  { %v278_v18 = vadd.f32 %v277_v17, %v258_v16 }
  0xcc   :  { %v297_v19 = vpop.f32.mrf.mxu0 }
  0xcd   :  { %v298_v20 = vadd.f32 %v297_v19, %v278_v18 }
  0xce   :  { %v317_v21 = vpop.f32.mrf.mxu1 }
  0xcf   :  { %v318_v22 = vadd.f32 %v317_v21, %v298_v20 }
  0xd0   :  { %v337_v23 = vpop.f32.mrf.mxu2 }
  0xd1   :  { %v338_v24 = vadd.f32 %v337_v23, %v318_v22 }
  0xd2   :  { %v357_v25 = vpop.f32.mrf.mxu3 }
  0xd3   :  { %v358_v26 = vadd.f32 %v357_v25, %v338_v24 }
  0xd5   :  { %v360_v27 = vmin.f32 %v358_v26, 0.0  ;;  %vm364_vm0 = vcmp.gt.f32.partialorder %v358_v26, 0.0 }
  0xd7   :  { %v361_v28 = vmul.f32 1.442695, %v360_v27 }
  0xd9   :  { %392 = vpow2.f32 %v361_v28 }
  0xdf   :  { %v393_v29 = vpop.eup %392 }
  0xe0   :  { %v385_v30 = vadd.f32 -1.0, %v393_v29 }
  0xe2   :  { %v365_v31 = vsel %vm364_vm0, %v358_v26, %v385_v30 }
  0xe3   :  { %366 = vst [vmem:[#allocation7] sm:$0x3] %v365_v31 }
  0xe4   :  { %377 = dma.vmem_to_hbm [thread:$0]  %s373_s24, 32, %s375_s27, [#allocation4]  }
  0xe5   :  { %470 = dma.done.wait [#allocation4], 32  }
  0xe6   :  { %471 = vsyncadd [#allocation4], 4294967264 }
  0xe7   :  { %382 = vsyncpa [#allocation3], 1 }
  0xe8   :  { %383 = vsyncpa [#allocation6], 1 }
  0xe9   :  { %384 = vsyncpa [#allocation4], 1 }

</bundles_post_ra>
